<compile_context>
chip_gen: v7x
topology: tpu7x:2x2x1
jax: 0.10.0
libtpu: 0.0.40
codegen_flags: <defaults>
</compile_context>

<pallas_src>
import functools

import jax
import jax.numpy as jnp
import numpy as np
from jax.experimental import pallas as pl
from jax.experimental.pallas import tpu as pltpu

INPUT_SIZE = 2
HIDDEN_SIZE = 32
OUTPUT_SIZE = 1


def _snn_fused_kernel(x_ref, w1_ref, b1_ref, w2_ref, b2_ref, out_ref, *,
                      inv_tau, v_th, decision_start, T, B, I, H, O):
    # Everything is tiny (a few KiB); load once, keep register/VMEM resident.
    x = x_ref[...]        # (T, B, I)
    w1 = w1_ref[...]      # (I, H)   = fc1.weight.T
    b1 = b1_ref[...]      # (1, H)
    w2r = w2_ref[...]     # (O, H)   = fc2.weight (rows)
    b2 = b2_ref[...]      # (1, O)

    # ---- fc1 hoisted out of the recurrence (no time dependence) --------------
    # h1_all[t, b, :] = sum_i x[t, b, i] * w1[i, :] + b1
    # K = I = 2, so this is just broadcast multiplies + adds on the VPU
    # (exact f32; no MXU involvement, no HIGHEST-precision decomposition).
    h1_all = x[:, :, 0:1] * w1[0:1, :]                       # (T, B, H)
    for i in range(1, I):
        h1_all = h1_all + x[:, :, i:i + 1] * w1[i:i + 1, :]
    h1_all = h1_all + b1                                     # bias, broadcast once

    # ---- sequential LIF recurrence, state carried as values (vregs) ----------
    v1 = jnp.zeros((B, H), jnp.float32)    # LIF1 membrane (reset_net -> 0)
    v2 = jnp.zeros((B, O), jnp.float32)    # LIF2 membrane
    acc = jnp.zeros((B, O), jnp.float32)   # decision-window spike accumulator

    # T is small and static -> fully unrolled loop; all indices below static.
    for t in range(T):
        h1 = h1_all[t]                                       # (B, H), static slice

        # LIF1: decay_input charge, fire (>=), hard reset to v_reset = 0.
        v1 = v1 + (h1 - v1) * inv_tau                        # inv_tau = 0.5 exact
        s1 = (v1 >= v_th).astype(jnp.float32)
        v1 = (1.0 - s1) * v1

        # fc2: output width O = 1 -> VPU multiply + XLU lane reduce.
        if O == 1:
            h2 = jnp.sum(s1 * w2r, axis=-1, keepdims=True) + b2          # (B, 1)
        else:
            h2 = jax.lax.dot_general(s1, w2r, (((1,), (1,)), ((), ())),
                                     preferred_element_type=jnp.float32) + b2

        # LIF2
        v2 = v2 + (h2 - v2) * inv_tau
        s2 = (v2 >= v_th).astype(jnp.float32)
        v2 = (1.0 - s2) * v2

        if t >= decision_start:            # static Python branch (zero cost)
            acc = acc + s2

    out_ref[...] = acc                     # single store at the end


def delayed_xor_snn_forward(x, w1, b1, w2, b2, *, tau=2.0, v_th=1.0):
    """x: (B, T, I) float32. w1: (I, H)=fc1.weight.T, b1: (1, H),
    w2: (H, O)=fc2.weight.T, b2: (1, O)."""
    B, T, I = x.shape
    H = w1.shape[1]
    O = w2.shape[1]
    decision_start = max(T - T // 4, T // 2)

    x_tbi = jnp.transpose(x, (1, 0, 2)).astype(jnp.float32)      # (T, B, I)
    w2_rows = jnp.transpose(w2, (1, 0)).astype(jnp.float32)      # (O, H)

    kernel = functools.partial(
        _snn_fused_kernel,
        inv_tau=float(1.0 / tau), v_th=float(v_th),
        decision_start=int(decision_start),
        T=int(T), B=int(B), I=int(I), H=int(H), O=int(O))

    vmem = pl.BlockSpec(memory_space=pltpu.MemorySpace.VMEM)
    return pl.pallas_call(
        kernel,
        out_shape=jax.ShapeDtypeStruct((B, O), jnp.float32),
        in_specs=[vmem, vmem, vmem, vmem, vmem],   # whole (tiny) arrays in VMEM
        out_specs=vmem,
    )(x_tbi,
      w1.astype(jnp.float32), b1.astype(jnp.float32),
      w2_rows, b2.astype(jnp.float32))


def reference_forward(x, w1, b1, w2, b2, *, tau=2.0, v_th=1.0):
    """Pure-JAX reference matching the PyTorch/spikingjelly forward
    (same math as fc1/fc2 Linear layers + LIF with hard reset)."""
    B, T, I = x.shape
    H = w1.shape[1]
    O = w2.shape[1]
    decision_start = max(T - T // 4, T // 2)
    w2_rows = jnp.transpose(w2, (1, 0))
    v1 = jnp.zeros((B, H), jnp.float32)
    v2 = jnp.zeros((B, O), jnp.float32)
    acc = jnp.zeros((B, O), jnp.float32)
    for t in range(T):
        x_t = x[:, t, :]
        # exact-f32 elementwise form of x_t @ w1 + b1 (same op order as kernel)
        h1 = x_t[:, 0:1] * w1[0:1, :]
        for i in range(1, I):
            h1 = h1 + x_t[:, i:i + 1] * w1[i:i + 1, :]
        h1 = h1 + b1
        v1 = v1 + (h1 - v1) / tau
        s1 = (v1 >= v_th).astype(jnp.float32)
        v1 = (1.0 - s1) * v1
        h2 = jnp.sum(s1[:, None, :] * w2_rows[None, :, :], axis=-1) + b2
        v2 = v2 + (h2 - v2) / tau
        s2 = (v2 >= v_th).astype(jnp.float32)
        v2 = (1.0 - s2) * v2
        if t >= decision_start:
            acc = acc + s2
    return acc


if __name__ == "__main__":
    B, T = 2, 8
    key = jax.random.PRNGKey(0)
    kx, kw1, kb1, kw2, kb2 = jax.random.split(key, 5)

    # deterministic "checkpoint": PyTorch-Linear-style U(-1/sqrt(fan_in), 1/sqrt(fan_in))
    bnd1 = 1.0 / np.sqrt(INPUT_SIZE)
    bnd2 = 1.0 / np.sqrt(HIDDEN_SIZE)
    w1 = jax.random.uniform(kw1, (INPUT_SIZE, HIDDEN_SIZE), jnp.float32, -bnd1, bnd1)   # fc1.weight.T
    b1 = jax.random.uniform(kb1, (1, HIDDEN_SIZE), jnp.float32, -bnd1, bnd1)            # fc1.bias
    w2 = jax.random.uniform(kw2, (HIDDEN_SIZE, OUTPUT_SIZE), jnp.float32, -bnd2, bnd2)  # fc2.weight.T
    b2 = jax.random.uniform(kb2, (1, OUTPUT_SIZE), jnp.float32, -bnd2, bnd2)            # fc2.bias

    # binary spike-train style input, (batch, seq, input) as in the PyTorch module
    x = (jax.random.uniform(kx, (B, T, INPUT_SIZE)) > 0.3).astype(jnp.float32) * 2.0

    out = delayed_xor_snn_forward(x, w1, b1, w2, b2)
    out = jax.block_until_ready(out)

    ref = reference_forward(x, w1, b1, w2, b2)
    np.testing.assert_allclose(np.asarray(out), np.asarray(ref), atol=1e-5, rtol=1e-5)

    # TODO(synk): surrogate.ATan only affects the backward pass; forward uses the
    # hard threshold, so nothing is lost here.
    print("KERNEL_OK")
</pallas_src>

<mosaic_0001>
module attributes {stable_mosaic.version = 11 : i64} {
  func.func @_snn_fused_kernel(%arg0: memref<8x2x2xf32, #tpu.memory_space<vmem>>, %arg1: memref<2x32xf32, #tpu.memory_space<vmem>>, %arg2: memref<1x32xf32, #tpu.memory_space<vmem>>, %arg3: memref<1x32xf32, #tpu.memory_space<vmem>>, %arg4: memref<1x1xf32, #tpu.memory_space<vmem>>, %arg5: memref<2x1xf32, #tpu.memory_space<vmem>>) attributes {dimension_semantics = [], scalar_prefetch = 0 : i64, scratch_operands = 0 : i64, tpu.core_type = #tpu.core_type<tc>} {
    %c0 = arith.constant 0 : index
    %c0_0 = arith.constant 0 : index
    %c0_1 = arith.constant 0 : index
    %0 = vector.load %arg0[%c0, %c0_0, %c0_1] : memref<8x2x2xf32, #tpu.memory_space<vmem>>, vector<8x2x2xf32>
    %c0_2 = arith.constant 0 : index
    %c0_3 = arith.constant 0 : index
    %1 = vector.load %arg1[%c0_2, %c0_3] : memref<2x32xf32, #tpu.memory_space<vmem>>, vector<2x32xf32>
    %c0_4 = arith.constant 0 : index
    %c0_5 = arith.constant 0 : index
    %2 = vector.load %arg2[%c0_4, %c0_5] : memref<1x32xf32, #tpu.memory_space<vmem>>, vector<1x32xf32>
    %c0_6 = arith.constant 0 : index
    %c0_7 = arith.constant 0 : index
    %3 = vector.load %arg3[%c0_6, %c0_7] : memref<1x32xf32, #tpu.memory_space<vmem>>, vector<1x32xf32>
    %c0_8 = arith.constant 0 : index
    %c0_9 = arith.constant 0 : index
    %4 = vector.load %arg4[%c0_8, %c0_9] : memref<1x1xf32, #tpu.memory_space<vmem>>, vector<1x1xf32>
    %5 = vector.extract_strided_slice %0 {offsets = [0, 0, 0], sizes = [8, 2, 1], strides = [1, 1, 1]} : vector<8x2x2xf32> to vector<8x2x1xf32>
    %6 = vector.extract_strided_slice %1 {offsets = [0, 0], sizes = [1, 32], strides = [1, 1]} : vector<2x32xf32> to vector<1x32xf32>
    %7 = vector.shape_cast %6 : vector<1x32xf32> to vector<1x1x32xf32>
    %8 = vector.broadcast %5 : vector<8x2x1xf32> to vector<8x2x32xf32>
    %9 = vector.broadcast %7 : vector<1x1x32xf32> to vector<8x2x32xf32>
    %10 = arith.mulf %8, %9 : vector<8x2x32xf32>
    %11 = vector.extract_strided_slice %0 {offsets = [0, 0, 1], sizes = [8, 2, 1], strides = [1, 1, 1]} : vector<8x2x2xf32> to vector<8x2x1xf32>
    %12 = vector.extract_strided_slice %1 {offsets = [1, 0], sizes = [1, 32], strides = [1, 1]} : vector<2x32xf32> to vector<1x32xf32>
    %13 = vector.shape_cast %12 : vector<1x32xf32> to vector<1x1x32xf32>
    %14 = vector.broadcast %11 : vector<8x2x1xf32> to vector<8x2x32xf32>
    %15 = vector.broadcast %13 : vector<1x1x32xf32> to vector<8x2x32xf32>
    %16 = arith.mulf %14, %15 : vector<8x2x32xf32>
    %17 = arith.addf %10, %16 : vector<8x2x32xf32>
    %18 = vector.shape_cast %2 : vector<1x32xf32> to vector<1x1x32xf32>
    %19 = vector.broadcast %18 : vector<1x1x32xf32> to vector<8x2x32xf32>
    %20 = arith.addf %17, %19 : vector<8x2x32xf32>
    %cst = arith.constant 0.000000e+00 : f32
    %21 = vector.broadcast %cst : f32 to vector<2x32xf32>
    %cst_10 = arith.constant 0.000000e+00 : f32
    %22 = vector.broadcast %cst_10 : f32 to vector<2x1xf32>
    %cst_11 = arith.constant 0.000000e+00 : f32
    %23 = vector.broadcast %cst_11 : f32 to vector<2x1xf32>
    %24 = vector.extract_strided_slice %20 {offsets = [0, 0, 0], sizes = [1, 2, 32], strides = [1, 1, 1]} : vector<8x2x32xf32> to vector<1x2x32xf32>
    %25 = vector.shape_cast %24 : vector<1x2x32xf32> to vector<2x32xf32>
    %26 = arith.subf %25, %21 : vector<2x32xf32>
    %cst_12 = arith.constant 5.000000e-01 : f32
    %27 = vector.broadcast %cst_12 : f32 to vector<2x32xf32>
    %28 = arith.mulf %26, %27 : vector<2x32xf32>
    %29 = arith.addf %21, %28 : vector<2x32xf32>
    %cst_13 = arith.constant 1.000000e+00 : f32
    %30 = vector.broadcast %cst_13 : f32 to vector<2x32xf32>
    %31 = arith.cmpf oge, %29, %30 : vector<2x32xf32>
    %32 = arith.extui %31 : vector<2x32xi1> to vector<2x32xi32>
    %33 = arith.sitofp %32 : vector<2x32xi32> to vector<2x32xf32>
    %cst_14 = arith.constant 1.000000e+00 : f32
    %34 = vector.broadcast %cst_14 : f32 to vector<2x32xf32>
    %35 = arith.subf %34, %33 : vector<2x32xf32>
    %36 = arith.mulf %35, %29 : vector<2x32xf32>
    %37 = vector.broadcast %3 : vector<1x32xf32> to vector<2x32xf32>
    %38 = arith.mulf %33, %37 : vector<2x32xf32>
    %cst_15 = arith.constant dense<0.000000e+00> : vector<2xf32>
    %39 = vector.multi_reduction <add>, %38, %cst_15 [1] : vector<2x32xf32> to vector<2xf32>
    %40 = vector.shape_cast %39 : vector<2xf32> to vector<2x1xf32>
    %41 = vector.broadcast %4 : vector<1x1xf32> to vector<2x1xf32>
    %42 = arith.addf %40, %41 : vector<2x1xf32>
    %43 = arith.subf %42, %22 : vector<2x1xf32>
    %cst_16 = arith.constant 5.000000e-01 : f32
    %44 = vector.broadcast %cst_16 : f32 to vector<2x1xf32>
    %45 = arith.mulf %43, %44 : vector<2x1xf32>
    %46 = arith.addf %22, %45 : vector<2x1xf32>
    %cst_17 = arith.constant 1.000000e+00 : f32
    %47 = vector.broadcast %cst_17 : f32 to vector<2x1xf32>
    %48 = arith.cmpf oge, %46, %47 : vector<2x1xf32>
    %49 = arith.extui %48 : vector<2x1xi1> to vector<2x1xi32>
    %50 = arith.sitofp %49 : vector<2x1xi32> to vector<2x1xf32>
    %cst_18 = arith.constant 1.000000e+00 : f32
    %51 = vector.broadcast %cst_18 : f32 to vector<2x1xf32>
    %52 = arith.subf %51, %50 : vector<2x1xf32>
    %53 = arith.mulf %52, %46 : vector<2x1xf32>
    %54 = vector.extract_strided_slice %20 {offsets = [1, 0, 0], sizes = [1, 2, 32], strides = [1, 1, 1]} : vector<8x2x32xf32> to vector<1x2x32xf32>
    %55 = vector.shape_cast %54 : vector<1x2x32xf32> to vector<2x32xf32>
    %56 = arith.subf %55, %36 : vector<2x32xf32>
    %cst_19 = arith.constant 5.000000e-01 : f32
    %57 = vector.broadcast %cst_19 : f32 to vector<2x32xf32>
    %58 = arith.mulf %56, %57 : vector<2x32xf32>
    %59 = arith.addf %36, %58 : vector<2x32xf32>
    %cst_20 = arith.constant 1.000000e+00 : f32
    %60 = vector.broadcast %cst_20 : f32 to vector<2x32xf32>
    %61 = arith.cmpf oge, %59, %60 : vector<2x32xf32>
    %62 = arith.extui %61 : vector<2x32xi1> to vector<2x32xi32>
    %63 = arith.sitofp %62 : vector<2x32xi32> to vector<2x32xf32>
    %cst_21 = arith.constant 1.000000e+00 : f32
    %64 = vector.broadcast %cst_21 : f32 to vector<2x32xf32>
    %65 = arith.subf %64, %63 : vector<2x32xf32>
    %66 = arith.mulf %65, %59 : vector<2x32xf32>
    %67 = vector.broadcast %3 : vector<1x32xf32> to vector<2x32xf32>
    %68 = arith.mulf %63, %67 : vector<2x32xf32>
    %cst_22 = arith.constant dense<0.000000e+00> : vector<2xf32>
    %69 = vector.multi_reduction <add>, %68, %cst_22 [1] : vector<2x32xf32> to vector<2xf32>
    %70 = vector.shape_cast %69 : vector<2xf32> to vector<2x1xf32>
    %71 = vector.broadcast %4 : vector<1x1xf32> to vector<2x1xf32>
    %72 = arith.addf %70, %71 : vector<2x1xf32>
    %73 = arith.subf %72, %53 : vector<2x1xf32>
    %cst_23 = arith.constant 5.000000e-01 : f32
    %74 = vector.broadcast %cst_23 : f32 to vector<2x1xf32>
    %75 = arith.mulf %73, %74 : vector<2x1xf32>
    %76 = arith.addf %53, %75 : vector<2x1xf32>
    %cst_24 = arith.constant 1.000000e+00 : f32
    %77 = vector.broadcast %cst_24 : f32 to vector<2x1xf32>
    %78 = arith.cmpf oge, %76, %77 : vector<2x1xf32>
    %79 = arith.extui %78 : vector<2x1xi1> to vector<2x1xi32>
    %80 = arith.sitofp %79 : vector<2x1xi32> to vector<2x1xf32>
    %cst_25 = arith.constant 1.000000e+00 : f32
    %81 = vector.broadcast %cst_25 : f32 to vector<2x1xf32>
    %82 = arith.subf %81, %80 : vector<2x1xf32>
    %83 = arith.mulf %82, %76 : vector<2x1xf32>
    %84 = vector.extract_strided_slice %20 {offsets = [2, 0, 0], sizes = [1, 2, 32], strides = [1, 1, 1]} : vector<8x2x32xf32> to vector<1x2x32xf32>
    %85 = vector.shape_cast %84 : vector<1x2x32xf32> to vector<2x32xf32>
    %86 = arith.subf %85, %66 : vector<2x32xf32>
    %cst_26 = arith.constant 5.000000e-01 : f32
    %87 = vector.broadcast %cst_26 : f32 to vector<2x32xf32>
    %88 = arith.mulf %86, %87 : vector<2x32xf32>
    %89 = arith.addf %66, %88 : vector<2x32xf32>
    %cst_27 = arith.constant 1.000000e+00 : f32
    %90 = vector.broadcast %cst_27 : f32 to vector<2x32xf32>
    %91 = arith.cmpf oge, %89, %90 : vector<2x32xf32>
    %92 = arith.extui %91 : vector<2x32xi1> to vector<2x32xi32>
    %93 = arith.sitofp %92 : vector<2x32xi32> to vector<2x32xf32>
    %cst_28 = arith.constant 1.000000e+00 : f32
    %94 = vector.broadcast %cst_28 : f32 to vector<2x32xf32>
    %95 = arith.subf %94, %93 : vector<2x32xf32>
    %96 = arith.mulf %95, %89 : vector<2x32xf32>
    %97 = vector.broadcast %3 : vector<1x32xf32> to vector<2x32xf32>
    %98 = arith.mulf %93, %97 : vector<2x32xf32>
    %cst_29 = arith.constant dense<0.000000e+00> : vector<2xf32>
    %99 = vector.multi_reduction <add>, %98, %cst_29 [1] : vector<2x32xf32> to vector<2xf32>
    %100 = vector.shape_cast %99 : vector<2xf32> to vector<2x1xf32>
    %101 = vector.broadcast %4 : vector<1x1xf32> to vector<2x1xf32>
    %102 = arith.addf %100, %101 : vector<2x1xf32>
    %103 = arith.subf %102, %83 : vector<2x1xf32>
    %cst_30 = arith.constant 5.000000e-01 : f32
    %104 = vector.broadcast %cst_30 : f32 to vector<2x1xf32>
    %105 = arith.mulf %103, %104 : vector<2x1xf32>
    %106 = arith.addf %83, %105 : vector<2x1xf32>
    %cst_31 = arith.constant 1.000000e+00 : f32
    %107 = vector.broadcast %cst_31 : f32 to vector<2x1xf32>
    %108 = arith.cmpf oge, %106, %107 : vector<2x1xf32>
    %109 = arith.extui %108 : vector<2x1xi1> to vector<2x1xi32>
    %110 = arith.sitofp %109 : vector<2x1xi32> to vector<2x1xf32>
    %cst_32 = arith.constant 1.000000e+00 : f32
    %111 = vector.broadcast %cst_32 : f32 to vector<2x1xf32>
    %112 = arith.subf %111, %110 : vector<2x1xf32>
    %113 = arith.mulf %112, %106 : vector<2x1xf32>
    %114 = vector.extract_strided_slice %20 {offsets = [3, 0, 0], sizes = [1, 2, 32], strides = [1, 1, 1]} : vector<8x2x32xf32> to vector<1x2x32xf32>
    %115 = vector.shape_cast %114 : vector<1x2x32xf32> to vector<2x32xf32>
    %116 = arith.subf %115, %96 : vector<2x32xf32>
    %cst_33 = arith.constant 5.000000e-01 : f32
    %117 = vector.broadcast %cst_33 : f32 to vector<2x32xf32>
    %118 = arith.mulf %116, %117 : vector<2x32xf32>
    %119 = arith.addf %96, %118 : vector<2x32xf32>
    %cst_34 = arith.constant 1.000000e+00 : f32
    %120 = vector.broadcast %cst_34 : f32 to vector<2x32xf32>
    %121 = arith.cmpf oge, %119, %120 : vector<2x32xf32>
    %122 = arith.extui %121 : vector<2x32xi1> to vector<2x32xi32>
    %123 = arith.sitofp %122 : vector<2x32xi32> to vector<2x32xf32>
    %cst_35 = arith.constant 1.000000e+00 : f32
    %124 = vector.broadcast %cst_35 : f32 to vector<2x32xf32>
    %125 = arith.subf %124, %123 : vector<2x32xf32>
    %126 = arith.mulf %125, %119 : vector<2x32xf32>
    %127 = vector.broadcast %3 : vector<1x32xf32> to vector<2x32xf32>
    %128 = arith.mulf %123, %127 : vector<2x32xf32>
    %cst_36 = arith.constant dense<0.000000e+00> : vector<2xf32>
    %129 = vector.multi_reduction <add>, %128, %cst_36 [1] : vector<2x32xf32> to vector<2xf32>
    %130 = vector.shape_cast %129 : vector<2xf32> to vector<2x1xf32>
    %131 = vector.broadcast %4 : vector<1x1xf32> to vector<2x1xf32>
    %132 = arith.addf %130, %131 : vector<2x1xf32>
    %133 = arith.subf %132, %113 : vector<2x1xf32>
    %cst_37 = arith.constant 5.000000e-01 : f32
    %134 = vector.broadcast %cst_37 : f32 to vector<2x1xf32>
    %135 = arith.mulf %133, %134 : vector<2x1xf32>
    %136 = arith.addf %113, %135 : vector<2x1xf32>
    %cst_38 = arith.constant 1.000000e+00 : f32
    %137 = vector.broadcast %cst_38 : f32 to vector<2x1xf32>
    %138 = arith.cmpf oge, %136, %137 : vector<2x1xf32>
    %139 = arith.extui %138 : vector<2x1xi1> to vector<2x1xi32>
    %140 = arith.sitofp %139 : vector<2x1xi32> to vector<2x1xf32>
    %cst_39 = arith.constant 1.000000e+00 : f32
    %141 = vector.broadcast %cst_39 : f32 to vector<2x1xf32>
    %142 = arith.subf %141, %140 : vector<2x1xf32>
    %143 = arith.mulf %142, %136 : vector<2x1xf32>
    %144 = vector.extract_strided_slice %20 {offsets = [4, 0, 0], sizes = [1, 2, 32], strides = [1, 1, 1]} : vector<8x2x32xf32> to vector<1x2x32xf32>
    %145 = vector.shape_cast %144 : vector<1x2x32xf32> to vector<2x32xf32>
    %146 = arith.subf %145, %126 : vector<2x32xf32>
    %cst_40 = arith.constant 5.000000e-01 : f32
    %147 = vector.broadcast %cst_40 : f32 to vector<2x32xf32>
    %148 = arith.mulf %146, %147 : vector<2x32xf32>
    %149 = arith.addf %126, %148 : vector<2x32xf32>
    %cst_41 = arith.constant 1.000000e+00 : f32
    %150 = vector.broadcast %cst_41 : f32 to vector<2x32xf32>
    %151 = arith.cmpf oge, %149, %150 : vector<2x32xf32>
    %152 = arith.extui %151 : vector<2x32xi1> to vector<2x32xi32>
    %153 = arith.sitofp %152 : vector<2x32xi32> to vector<2x32xf32>
    %cst_42 = arith.constant 1.000000e+00 : f32
    %154 = vector.broadcast %cst_42 : f32 to vector<2x32xf32>
    %155 = arith.subf %154, %153 : vector<2x32xf32>
    %156 = arith.mulf %155, %149 : vector<2x32xf32>
    %157 = vector.broadcast %3 : vector<1x32xf32> to vector<2x32xf32>
    %158 = arith.mulf %153, %157 : vector<2x32xf32>
    %cst_43 = arith.constant dense<0.000000e+00> : vector<2xf32>
    %159 = vector.multi_reduction <add>, %158, %cst_43 [1] : vector<2x32xf32> to vector<2xf32>
    %160 = vector.shape_cast %159 : vector<2xf32> to vector<2x1xf32>
    %161 = vector.broadcast %4 : vector<1x1xf32> to vector<2x1xf32>
    %162 = arith.addf %160, %161 : vector<2x1xf32>
    %163 = arith.subf %162, %143 : vector<2x1xf32>
    %cst_44 = arith.constant 5.000000e-01 : f32
    %164 = vector.broadcast %cst_44 : f32 to vector<2x1xf32>
    %165 = arith.mulf %163, %164 : vector<2x1xf32>
    %166 = arith.addf %143, %165 : vector<2x1xf32>
    %cst_45 = arith.constant 1.000000e+00 : f32
    %167 = vector.broadcast %cst_45 : f32 to vector<2x1xf32>
    %168 = arith.cmpf oge, %166, %167 : vector<2x1xf32>
    %169 = arith.extui %168 : vector<2x1xi1> to vector<2x1xi32>
    %170 = arith.sitofp %169 : vector<2x1xi32> to vector<2x1xf32>
    %cst_46 = arith.constant 1.000000e+00 : f32
    %171 = vector.broadcast %cst_46 : f32 to vector<2x1xf32>
    %172 = arith.subf %171, %170 : vector<2x1xf32>
    %173 = arith.mulf %172, %166 : vector<2x1xf32>
    %174 = vector.extract_strided_slice %20 {offsets = [5, 0, 0], sizes = [1, 2, 32], strides = [1, 1, 1]} : vector<8x2x32xf32> to vector<1x2x32xf32>
    %175 = vector.shape_cast %174 : vector<1x2x32xf32> to vector<2x32xf32>
    %176 = arith.subf %175, %156 : vector<2x32xf32>
    %cst_47 = arith.constant 5.000000e-01 : f32
    %177 = vector.broadcast %cst_47 : f32 to vector<2x32xf32>
    %178 = arith.mulf %176, %177 : vector<2x32xf32>
    %179 = arith.addf %156, %178 : vector<2x32xf32>
    %cst_48 = arith.constant 1.000000e+00 : f32
    %180 = vector.broadcast %cst_48 : f32 to vector<2x32xf32>
    %181 = arith.cmpf oge, %179, %180 : vector<2x32xf32>
    %182 = arith.extui %181 : vector<2x32xi1> to vector<2x32xi32>
    %183 = arith.sitofp %182 : vector<2x32xi32> to vector<2x32xf32>
    %cst_49 = arith.constant 1.000000e+00 : f32
    %184 = vector.broadcast %cst_49 : f32 to vector<2x32xf32>
    %185 = arith.subf %184, %183 : vector<2x32xf32>
    %186 = arith.mulf %185, %179 : vector<2x32xf32>
    %187 = vector.broadcast %3 : vector<1x32xf32> to vector<2x32xf32>
    %188 = arith.mulf %183, %187 : vector<2x32xf32>
    %cst_50 = arith.constant dense<0.000000e+00> : vector<2xf32>
    %189 = vector.multi_reduction <add>, %188, %cst_50 [1] : vector<2x32xf32> to vector<2xf32>
    %190 = vector.shape_cast %189 : vector<2xf32> to vector<2x1xf32>
    %191 = vector.broadcast %4 : vector<1x1xf32> to vector<2x1xf32>
    %192 = arith.addf %190, %191 : vector<2x1xf32>
    %193 = arith.subf %192, %173 : vector<2x1xf32>
    %cst_51 = arith.constant 5.000000e-01 : f32
    %194 = vector.broadcast %cst_51 : f32 to vector<2x1xf32>
    %195 = arith.mulf %193, %194 : vector<2x1xf32>
    %196 = arith.addf %173, %195 : vector<2x1xf32>
    %cst_52 = arith.constant 1.000000e+00 : f32
    %197 = vector.broadcast %cst_52 : f32 to vector<2x1xf32>
    %198 = arith.cmpf oge, %196, %197 : vector<2x1xf32>
    %199 = arith.extui %198 : vector<2x1xi1> to vector<2x1xi32>
    %200 = arith.sitofp %199 : vector<2x1xi32> to vector<2x1xf32>
    %cst_53 = arith.constant 1.000000e+00 : f32
    %201 = vector.broadcast %cst_53 : f32 to vector<2x1xf32>
    %202 = arith.subf %201, %200 : vector<2x1xf32>
    %203 = arith.mulf %202, %196 : vector<2x1xf32>
    %204 = vector.extract_strided_slice %20 {offsets = [6, 0, 0], sizes = [1, 2, 32], strides = [1, 1, 1]} : vector<8x2x32xf32> to vector<1x2x32xf32>
    %205 = vector.shape_cast %204 : vector<1x2x32xf32> to vector<2x32xf32>
    %206 = arith.subf %205, %186 : vector<2x32xf32>
    %cst_54 = arith.constant 5.000000e-01 : f32
    %207 = vector.broadcast %cst_54 : f32 to vector<2x32xf32>
    %208 = arith.mulf %206, %207 : vector<2x32xf32>
    %209 = arith.addf %186, %208 : vector<2x32xf32>
    %cst_55 = arith.constant 1.000000e+00 : f32
    %210 = vector.broadcast %cst_55 : f32 to vector<2x32xf32>
    %211 = arith.cmpf oge, %209, %210 : vector<2x32xf32>
    %212 = arith.extui %211 : vector<2x32xi1> to vector<2x32xi32>
    %213 = arith.sitofp %212 : vector<2x32xi32> to vector<2x32xf32>
    %cst_56 = arith.constant 1.000000e+00 : f32
    %214 = vector.broadcast %cst_56 : f32 to vector<2x32xf32>
    %215 = arith.subf %214, %213 : vector<2x32xf32>
    %216 = arith.mulf %215, %209 : vector<2x32xf32>
    %217 = vector.broadcast %3 : vector<1x32xf32> to vector<2x32xf32>
    %218 = arith.mulf %213, %217 : vector<2x32xf32>
    %cst_57 = arith.constant dense<0.000000e+00> : vector<2xf32>
    %219 = vector.multi_reduction <add>, %218, %cst_57 [1] : vector<2x32xf32> to vector<2xf32>
    %220 = vector.shape_cast %219 : vector<2xf32> to vector<2x1xf32>
    %221 = vector.broadcast %4 : vector<1x1xf32> to vector<2x1xf32>
    %222 = arith.addf %220, %221 : vector<2x1xf32>
    %223 = arith.subf %222, %203 : vector<2x1xf32>
    %cst_58 = arith.constant 5.000000e-01 : f32
    %224 = vector.broadcast %cst_58 : f32 to vector<2x1xf32>
    %225 = arith.mulf %223, %224 : vector<2x1xf32>
    %226 = arith.addf %203, %225 : vector<2x1xf32>
    %cst_59 = arith.constant 1.000000e+00 : f32
    %227 = vector.broadcast %cst_59 : f32 to vector<2x1xf32>
    %228 = arith.cmpf oge, %226, %227 : vector<2x1xf32>
    %229 = arith.extui %228 : vector<2x1xi1> to vector<2x1xi32>
    %230 = arith.sitofp %229 : vector<2x1xi32> to vector<2x1xf32>
    %cst_60 = arith.constant 1.000000e+00 : f32
    %231 = vector.broadcast %cst_60 : f32 to vector<2x1xf32>
    %232 = arith.subf %231, %230 : vector<2x1xf32>
    %233 = arith.mulf %232, %226 : vector<2x1xf32>
    %234 = arith.addf %23, %230 : vector<2x1xf32>
    %235 = vector.extract_strided_slice %20 {offsets = [7, 0, 0], sizes = [1, 2, 32], strides = [1, 1, 1]} : vector<8x2x32xf32> to vector<1x2x32xf32>
    %236 = vector.shape_cast %235 : vector<1x2x32xf32> to vector<2x32xf32>
    %237 = arith.subf %236, %216 : vector<2x32xf32>
    %cst_61 = arith.constant 5.000000e-01 : f32
    %238 = vector.broadcast %cst_61 : f32 to vector<2x32xf32>
    %239 = arith.mulf %237, %238 : vector<2x32xf32>
    %240 = arith.addf %216, %239 : vector<2x32xf32>
    %cst_62 = arith.constant 1.000000e+00 : f32
    %241 = vector.broadcast %cst_62 : f32 to vector<2x32xf32>
    %242 = arith.cmpf oge, %240, %241 : vector<2x32xf32>
    %243 = arith.extui %242 : vector<2x32xi1> to vector<2x32xi32>
    %244 = arith.sitofp %243 : vector<2x32xi32> to vector<2x32xf32>
    %245 = vector.broadcast %3 : vector<1x32xf32> to vector<2x32xf32>
    %246 = arith.mulf %244, %245 : vector<2x32xf32>
    %cst_63 = arith.constant dense<0.000000e+00> : vector<2xf32>
    %247 = vector.multi_reduction <add>, %246, %cst_63 [1] : vector<2x32xf32> to vector<2xf32>
    %248 = vector.shape_cast %247 : vector<2xf32> to vector<2x1xf32>
    %249 = vector.broadcast %4 : vector<1x1xf32> to vector<2x1xf32>
    %250 = arith.addf %248, %249 : vector<2x1xf32>
    %251 = arith.subf %250, %233 : vector<2x1xf32>
    %cst_64 = arith.constant 5.000000e-01 : f32
    %252 = vector.broadcast %cst_64 : f32 to vector<2x1xf32>
    %253 = arith.mulf %251, %252 : vector<2x1xf32>
    %254 = arith.addf %233, %253 : vector<2x1xf32>
    %cst_65 = arith.constant 1.000000e+00 : f32
    %255 = vector.broadcast %cst_65 : f32 to vector<2x1xf32>
    %256 = arith.cmpf oge, %254, %255 : vector<2x1xf32>
    %257 = arith.extui %256 : vector<2x1xi1> to vector<2x1xi32>
    %258 = arith.sitofp %257 : vector<2x1xi32> to vector<2x1xf32>
    %259 = arith.addf %234, %258 : vector<2x1xf32>
    %c0_66 = arith.constant 0 : index
    %c0_67 = arith.constant 0 : index
    %260 = vector.load %arg5[%c0_66, %c0_67] : memref<2x1xf32, #tpu.memory_space<vmem>>, vector<2x1xf32>
    tpu.vector_store %arg5[%c0_66, %c0_67], %259 {strides = array<i32>} : memref<2x1xf32, #tpu.memory_space<vmem>>, vector<2x1xf32>,
    return
  }
}

</mosaic_0001>

<bundles_post_ra>
// kernel: tpu_custom_call.1
= control target key start
LH: loop header
LB: loop body
LE: loop exit
PB: predicated region body
PF: predicated region fallthrough
CT: control target
= control target key end

     0   :  { %v362_v0 = vmov 0   ;;  %v363_v3 = vmov 1   ;;  %v74_v11 = vlaneseq  ;;  %v364_v36 = vmov 0.0   ;;  %s508_s0 = inlined_call_operand.vmem [shape: f32[8,2,2], index: 0, kind: input, shape index: {}]   ;;  %s509_s4 = inlined_call_operand.<no memory space> [shape: f32[1,1], index: 4, kind: input, shape index: {}]   ;;  %s510_s1 = inlined_call_operand.vmem [shape: f32[2,32], index: 1, kind: input, shape index: {}]   ;;  %s511_s2 = inlined_call_operand.vmem [shape: f32[1,32], index: 2, kind: input, shape index: {}]   ;;  %s512_s3 = inlined_call_operand.vmem [shape: f32[1,32], index: 3, kind: input, shape index: {}]   ;;  %s513_s5 = inlined_call_operand.vmem [shape: f32[2,1], index: 5, kind: output, shape index: {}]  }
   0x1   :  { %359 = vset.pattern.permute.xlu1 %v362_v0  ;;  %357 = vset.pattern.permute.xlu0 %v362_v0  ;;  %v23_v1 = vld [vmem:[%s508_s0 + $0x2] sm:$0x3]  ;;  %v22_v2 = vld [vmem:[%s508_s0] sm:$0x3]  ;;  %v24_v4 = vld [vmem:[%s508_s0 + $0x4] sm:$0x3]  ;;  %v10_v10 = vstv %s509_s4 }
   0x2   :  { %41 = vperm.xlu1 %359, %v23_v1   ;;  %36 = vperm.xlu0 %357, %v22_v2   ;;  %v25_v5 = vld [vmem:[%s508_s0 + $0x6] sm:$0x3]  ;;  %v26_v6 = vld [vmem:[%s508_s0 + $0x8] sm:$0x3]  ;;  %v27_v7 = vld [vmem:[%s508_s0 + $0xa] sm:$0x3] }
   0x3   :  { %v28_v8 = vld [vmem:[%s508_s0 + $0xc] sm:$0x3]  ;;  %v29_v9 = vld [vmem:[%s508_s0 + $0xe] sm:$0x3]  ;;  %11 = vst [vmem:[#allocation2] sm:$0x1] %v10_v10 }
   0x4   :  { %v75_v12 = vshrl.u32 %v74_v11, 7  ;;  %v30_v15 = vld [vmem:[%s510_s1] sm:$0x3]  ;;  %vm166_vm1 = vcmask 254976  }
   0x5   :  { %v434_v24 = vld [vmem:[%s511_s2] ss:$0 sm:$0xff] }
   0x6   :  { %360 = vset.pattern.permute.xlu1 %v363_v3  ;;  %358 = vset.pattern.permute.xlu0 %v363_v3  ;;  %v76_v13 = vsub.s32 0, %v75_v12  ;;  %v120_v14 = vsub.s32 1, %v75_v12  ;;  %v442_v33 = vld [vmem:[%s512_s3] ss:$0 sm:$0xff] }
   0x7   :  { %91 = vperm.xlu1 %360, %v23_v1   ;;  %87 = vperm.xlu0 %358, %v22_v2  }
   0x8   :  { %v425_v18 = vrot.slane %v30_v15, %v76_v13  ;;  %v427_v19 = vrot.slane %v30_v15, %v120_v14 }
   0xb   :  { %361 = vset.pattern.permute.xlu1 %v362_v0  ;;  %95 = vperm.xlu0 %358, %v24_v4  }
   0xc   :  { %46 = vperm.xlu1 %361, %v24_v4  }
   0xf   :  { %99 = vperm.xlu0 %358, %v25_v5  }
  0x10   :  { %51 = vperm.xlu1 %361, %v25_v5  }
  0x13   :  { %103 = vperm.xlu0 %358, %v26_v6  }
  0x14   :  { %56 = vperm.xlu1 %361, %v26_v6  }
  0x17   :  { %107 = vperm.xlu0 %358, %v27_v7  }
  0x18   :  { %61 = vperm.xlu1 %361, %v27_v7  }
  0x1b   :  { %111 = vperm.xlu0 %358, %v28_v8  }
  0x1c   :  { %66 = vperm.xlu1 %361, %v28_v8  }
  0x1f   :  { %115 = vperm.xlu0 %358, %v29_v9  }
  0x20   :  { %71 = vperm.xlu1 %361, %v29_v9  }
  0x81   :  { %v37_v16 = vpop.permute.xlu0 %36  ;;  %v42_v17 = vpop.permute.xlu1 %41 }
  0x82   :  { %v78_v22 = vmul.f32 %v425_v18, %v37_v16  ;;  %v79_v27 = vmul.f32 %v425_v18, %v42_v17 }
  0x86   :  { %v88_v20 = vpop.permute.xlu0 %87  ;;  %v92_v21 = vpop.permute.xlu1 %91 }
  0x87   :  { %v122_v23 = vmul.f32 %v427_v19, %v88_v20  ;;  %v123_v29 = vmul.f32 %v427_v19, %v92_v21 }
  0x89   :  { %v130_v25 = vadd.f32 %v122_v23, %v78_v22  ;;  %v131_v34 = vadd.f32 %v123_v29, %v79_v27 }
  0x8a   :  { %v96_v26 = vpop.permute.xlu0 %95 }
  0x8b   :  { %v144_v28 = vadd.f32 %v434_v24, %v130_v25  ;;  %v47_v30 = vpop.permute.xlu1 %46  ;;  %v145_v41 = vadd.f32 %v434_v24, %v131_v34  ;;  %v124_v47 = vmul.f32 %v427_v19, %v96_v26 }
  0x8c   :  { %v80_v48 = vmul.f32 %v425_v18, %v47_v30 }
  0x8d   :  { %v152_v31 = vmul.f32 0.5, %v144_v28 }
  0x8e   :  { %v100_v32 = vpop.permute.xlu0 %99  ;;  %v132_v53 = vadd.f32 %v124_v47, %v80_v48 }
  0x8f   :  { %v52_v35 = vpop.permute.xlu1 %51  ;;  %vm154_vm0 = vcmp.ge.f32.partialorder %v152_v31, 1.0  ;;  %v125_v7 = vmul.f32 %v427_v19, %v100_v32 }
  0x90   :  { %v336_v37 = vsel %vm154_vm0, 1.0, %v364_v36  ;;  %v146_v62 = vadd.f32 %v434_v24, %v132_v53  ;;  %v81_v8 = vmul.f32 %v425_v18, %v52_v35 }
  0x91   :  { %v165_v38 = vmul.f32 %v442_v33, %v336_v37  ;;  %v157_v39 = vsub.f32 1.0, %v336_v37 }
  0x92   :  { %v104_v40 = vpop.permute.xlu0 %103  ;;  %v133_v12 = vadd.f32 %v125_v7, %v81_v8 }
  0x93   :  { %v57_v42 = vpop.permute.xlu1 %56  ;;  %v167_v43 = vsel %vm166_vm1, %v165_v38, 0.0  ;;  %v158_v44 = vmul.f32 %v157_v39, %v152_v31  ;;  %v126_v22 = vmul.f32 %v427_v19, %v104_v40 }
  0x94   :  { %168 = vadd.xlane.f32.xlu1 %v167_v43  ;;  %v147_v16 = vadd.f32 %v434_v24, %v133_v12  ;;  %v82_v23 = vmul.f32 %v425_v18, %v57_v42 }
  0x95   :  { %v184_v45 = vsub.f32 %v145_v41, %v158_v44 }
  0x96   :  { %v108_v46 = vpop.permute.xlu0 %107  ;;  %v134_v27 = vadd.f32 %v126_v22, %v82_v23 }
  0x97   :  { %v62_v49 = vpop.permute.xlu1 %61  ;;  %v185_v50 = vmul.f32 0.5, %v184_v45  ;;  %v127_v37 = vmul.f32 %v427_v19, %v108_v46 }
  0x98   :  { %v148_v31 = vadd.f32 %v434_v24, %v134_v27  ;;  %v83_v38 = vmul.f32 %v425_v18, %v62_v49 }
  0x99   :  { %v186_v51 = vadd.f32 %v185_v50, %v158_v44 }
  0x9a   :  { %v112_v52 = vpop.permute.xlu0 %111  ;;  %v135_v41 = vadd.f32 %v127_v37, %v83_v38 }
  0x9b   :  { %v128_v54 = vmul.f32 %v427_v19, %v112_v52  ;;  %v67_v55 = vpop.permute.xlu1 %66  ;;  %vm187_vm2 = vcmp.ge.f32.partialorder %v186_v51, 1.0 }
  0x9c   :  { %v84_v56 = vmul.f32 %v425_v18, %v67_v55  ;;  %v340_v57 = vsel %vm187_vm2, 1.0, %v364_v36  ;;  %v149_v45 = vadd.f32 %v434_v24, %v135_v41 }
  0x9d   :  { %v192_v58 = vmul.f32 %v340_v57, %v442_v33  ;;  %v190_v59 = vsub.f32 1.0, %v340_v57 }
  0x9e   :  { %v136_v60 = vadd.f32 %v128_v54, %v84_v56  ;;  %v116_v61 = vpop.permute.xlu0 %115 }
  0x9f   :  { %v129_v63 = vmul.f32 %v427_v19, %v116_v61  ;;  %v72_v0 = vpop.permute.xlu1 %71  ;;  %v193_v1 = vsel %vm166_vm1, %v192_v58, 0.0  ;;  %v191_v2 = vmul.f32 %v190_v59, %v186_v51 }
  0xa0   :  { %v150_v3 = vadd.f32 %v434_v24, %v136_v60  ;;  %v85_v4 = vmul.f32 %v425_v18, %v72_v0  ;;  %194 = vadd.xlane.f32.xlu0 %v193_v1 }
  0xa1   :  { %v205_v5 = vsub.f32 %v146_v62, %v191_v2 }
  0xa2   :  { %v137_v6 = vadd.f32 %v129_v63, %v85_v4 }
  0xa3   :  { %v206_v9 = vmul.f32 0.5, %v205_v5 }
  0xa4   :  { %v151_v10 = vadd.f32 %v434_v24, %v137_v6 }
  0xa5   :  { %v207_v11 = vadd.f32 %v206_v9, %v191_v2 }
  0xa7   :  { %vm208_vm3 = vcmp.ge.f32.partialorder %v207_v11, 1.0 }
  0xa8   :  { %v342_v13 = vsel %vm208_vm3, 1.0, %v364_v36 }
  0xa9   :  { %v213_v14 = vmul.f32 %v342_v13, %v442_v33  ;;  %v211_v15 = vsub.f32 1.0, %v342_v13 }
  0xab   :  { %v214_v17 = vsel %vm166_vm1, %v213_v14, 0.0  ;;  %v212_v20 = vmul.f32 %v211_v15, %v207_v11 }
  0xac   :  { %215 = vadd.xlane.f32.xlu0 %v214_v17 }
  0xad   :  { %v226_v21 = vsub.f32 %v147_v16, %v212_v20 }
  0xaf   :  { %v227_v25 = vmul.f32 0.5, %v226_v21 }
  0xb1   :  { %v228_v26 = vadd.f32 %v227_v25, %v212_v20 }
  0xb3   :  { %vm229_vm4 = vcmp.ge.f32.partialorder %v228_v26, 1.0 }
  0xb4   :  { %v344_v28 = vsel %vm229_vm4, 1.0, %v364_v36 }
  0xb5   :  { %v234_v29 = vmul.f32 %v344_v28, %v442_v33  ;;  %v232_v30 = vsub.f32 1.0, %v344_v28 }
  0xb7   :  { %v235_v32 = vsel %vm166_vm1, %v234_v29, 0.0  ;;  %v233_v34 = vmul.f32 %v232_v30, %v228_v26 }
  0xb8   :  { %236 = vadd.xlane.f32.xlu1 %v235_v32 }
  0xb9   :  { %v247_v35 = vsub.f32 %v148_v31, %v233_v34 }
  0xbb   :  { %v248_v39 = vmul.f32 0.5, %v247_v35 }
  0xbd   :  { %v249_v40 = vadd.f32 %v248_v39, %v233_v34 }
  0xbf   :  { %vm250_vm5 = vcmp.ge.f32.partialorder %v249_v40, 1.0 }
  0xc0   :  { %v346_v42 = vsel %vm250_vm5, 1.0, %v364_v36 }
  0xc1   :  { %v255_v43 = vmul.f32 %v346_v42, %v442_v33  ;;  %v253_v44 = vsub.f32 1.0, %v346_v42 }
  0xc3   :  { %v256_v47 = vsel %vm166_vm1, %v255_v43, 0.0  ;;  %v254_v48 = vmul.f32 %v253_v44, %v249_v40 }
  0xc4   :  { %257 = vadd.xlane.f32.xlu0 %v256_v47 }
  0xc5   :  { %v268_v50 = vsub.f32 %v149_v45, %v254_v48 }
  0xc7   :  { %v269_v51 = vmul.f32 0.5, %v268_v50 }
  0xc9   :  { %v270_v19 = vadd.f32 %v269_v51, %v254_v48 }
  0xcb   :  { %vm271_vm6 = vcmp.ge.f32.partialorder %v270_v19, 1.0 }
  0xcc   :  { %v348_v18 = vsel %vm271_vm6, 1.0, %v364_v36 }
  0xcd   :  { %v276_v46 = vmul.f32 %v348_v18, %v442_v33  ;;  %v274_v49 = vsub.f32 1.0, %v348_v18 }
  0xcf   :  { %v277_v52 = vsel %vm166_vm1, %v276_v46, 0.0  ;;  %v275_v53 = vmul.f32 %v274_v49, %v270_v19 }
  0xd0   :  { %278 = vadd.xlane.f32.xlu1 %v277_v52 }
  0xd1   :  { %v289_v54 = vsub.f32 %v150_v3, %v275_v53  ;;  %v487_v3 = vld [vmem:[#allocation2] ss:$0 sm:$0xff] }
  0xd3   :  { %v290_v55 = vmul.f32 0.5, %v289_v54 }
  0xd5   :  { %v291_v24 = vadd.f32 %v290_v55, %v275_v53 }
  0xd7   :  { %vm292_vm7 = vcmp.ge.f32.partialorder %v291_v24, 1.0 }
  0xd8   :  { %v350_v56 = vsel %vm292_vm7, 1.0, %v364_v36 }
  0xd9   :  { %v297_v57 = vmul.f32 %v350_v56, %v442_v33  ;;  %v295_v58 = vsub.f32 1.0, %v350_v56 }
  0xdb   :  { %v298_v59 = vsel %vm166_vm1, %v297_v57, 0.0  ;;  %v296_v60 = vmul.f32 %v295_v58, %v291_v24 }
  0xdc   :  { %299 = vadd.xlane.f32.xlu0 %v298_v59 }
  0xdd   :  { %v311_v61 = vsub.f32 %v151_v10, %v296_v60 }
  0xdf   :  { %v312_v62 = vmul.f32 0.5, %v311_v61 }
  0xe1   :  { %v313_v63 = vadd.f32 %v312_v62, %v296_v60 }
  0xe3   :  { %vm314_vm8 = vcmp.ge.f32.partialorder %v313_v63, 1.0 }
  0xe4   :  { %v352_v0 = vsel %vm314_vm8, 1.0, %v364_v36 }
  0xe5   :  { %v317_v1 = vmul.f32 %v352_v0, %v442_v33 }
  0xe7   :  { %v318_v2 = vsel %vm166_vm1, %v317_v1, 0.0  ;;  %vm329_vm1 = vcmask 1024  }
  0xe8   :  { %319 = vadd.xlane.f32.xlu1 %v318_v2 }
 0x121   :  { %v169_v4 = vpop.xlane.xlu1 %168 }
 0x122   :  { %v176_v5 = vadd.f32 %v487_v3, %v169_v4 }
 0x124   :  { %v177_v6 = vmul.f32 0.5, %v176_v5 }
 0x126   :  { %vm179_vm9 = vcmp.ge.f32.partialorder %v177_v6, 1.0 }
 0x127   :  { %v339_v7 = vsel %vm179_vm9, 1.0, %v364_v36 }
 0x128   :  { %v182_v8 = vsub.f32 1.0, %v339_v7 }
 0x12a   :  { %v183_v10 = vmul.f32 %v182_v8, %v177_v6 }
 0x12d   :  { %v195_v9 = vpop.xlane.xlu0 %194 }
 0x12e   :  { %v196_v11 = vadd.f32 %v487_v3, %v195_v9 }
 0x130   :  { %v197_v12 = vsub.f32 %v196_v11, %v183_v10 }
 0x132   :  { %v198_v13 = vmul.f32 0.5, %v197_v12 }
 0x134   :  { %v199_v33 = vadd.f32 %v198_v13, %v183_v10 }
 0x136   :  { %vm200_vm10 = vcmp.ge.f32.partialorder %v199_v33, 1.0 }
 0x137   :  { %v341_v14 = vsel %vm200_vm10, 1.0, %v364_v36 }
 0x138   :  { %v203_v15 = vsub.f32 1.0, %v341_v14 }
 0x139   :  { %v216_v16 = vpop.xlane.xlu0 %215 }
 0x13a   :  { %v204_v17 = vmul.f32 %v203_v15, %v199_v33  ;;  %v217_v20 = vadd.f32 %v487_v3, %v216_v16 }
 0x13c   :  { %v218_v21 = vsub.f32 %v217_v20, %v204_v17 }
 0x13e   :  { %v219_v22 = vmul.f32 0.5, %v218_v21 }
 0x140   :  { %v220_v23 = vadd.f32 %v219_v22, %v204_v17 }
 0x142   :  { %vm221_vm11 = vcmp.ge.f32.partialorder %v220_v23, 1.0 }
 0x143   :  { %v343_v25 = vsel %vm221_vm11, 1.0, %v364_v36 }
 0x144   :  { %v224_v26 = vsub.f32 1.0, %v343_v25 }
 0x145   :  { %v237_v27 = vpop.xlane.xlu1 %236 }
 0x146   :  { %v225_v28 = vmul.f32 %v224_v26, %v220_v23  ;;  %v238_v29 = vadd.f32 %v487_v3, %v237_v27 }
 0x148   :  { %v239_v30 = vsub.f32 %v238_v29, %v225_v28 }
 0x14a   :  { %v240_v31 = vmul.f32 0.5, %v239_v30 }
 0x14c   :  { %v241_v32 = vadd.f32 %v240_v31, %v225_v28 }
 0x14e   :  { %vm242_vm12 = vcmp.ge.f32.partialorder %v241_v32, 1.0 }
 0x14f   :  { %v345_v34 = vsel %vm242_vm12, 1.0, %v364_v36 }
 0x150   :  { %v245_v35 = vsub.f32 1.0, %v345_v34 }
 0x151   :  { %v258_v37 = vpop.xlane.xlu0 %257 }
 0x152   :  { %v246_v38 = vmul.f32 %v245_v35, %v241_v32  ;;  %v259_v39 = vadd.f32 %v487_v3, %v258_v37 }
 0x154   :  { %v260_v40 = vsub.f32 %v259_v39, %v246_v38 }
 0x156   :  { %v261_v41 = vmul.f32 0.5, %v260_v40 }
 0x158   :  { %v262_v42 = vadd.f32 %v261_v41, %v246_v38 }
 0x15a   :  { %vm263_vm13 = vcmp.ge.f32.partialorder %v262_v42, 1.0 }
 0x15b   :  { %v347_v43 = vsel %vm263_vm13, 1.0, %v364_v36 }
 0x15c   :  { %v266_v44 = vsub.f32 1.0, %v347_v43 }
 0x15d   :  { %v279_v45 = vpop.xlane.xlu1 %278 }
 0x15e   :  { %v267_v47 = vmul.f32 %v266_v44, %v262_v42  ;;  %v280_v48 = vadd.f32 %v487_v3, %v279_v45 }
 0x160   :  { %v281_v50 = vsub.f32 %v280_v48, %v267_v47 }
 0x162   :  { %v282_v51 = vmul.f32 0.5, %v281_v50 }
 0x164   :  { %v283_v19 = vadd.f32 %v282_v51, %v267_v47 }
 0x166   :  { %vm284_vm14 = vcmp.ge.f32.partialorder %v283_v19, 1.0 }
 0x167   :  { %v349_v18 = vsel %vm284_vm14, 1.0, %v364_v36 }
 0x168   :  { %v287_v46 = vsub.f32 1.0, %v349_v18 }
 0x169   :  { %v300_v49 = vpop.xlane.xlu0 %299 }
 0x16a   :  { %v288_v52 = vmul.f32 %v287_v46, %v283_v19  ;;  %v301_v53 = vadd.f32 %v487_v3, %v300_v49 }
 0x16c   :  { %v302_v54 = vsub.f32 %v301_v53, %v288_v52 }
 0x16e   :  { %v303_v55 = vmul.f32 0.5, %v302_v54 }
 0x170   :  { %v304_v24 = vadd.f32 %v303_v55, %v288_v52 }
 0x172   :  { %vm305_vm15 = vcmp.ge.f32.partialorder %v304_v24, 1.0 }
 0x173   :  { %v351_v56 = vsel %vm305_vm15, 1.0, %v364_v36 }
 0x174   :  { %v308_v57 = vsub.f32 1.0, %v351_v56 }
 0x175   :  { %v320_v58 = vpop.xlane.xlu1 %319 }
 0x176   :  { %v309_v59 = vmul.f32 %v308_v57, %v304_v24  ;;  %v321_v60 = vadd.f32 %v487_v3, %v320_v58 }
 0x178   :  { %v322_v61 = vsub.f32 %v321_v60, %v309_v59 }
 0x17a   :  { %v323_v62 = vmul.f32 0.5, %v322_v61 }
 0x17c   :  { %v324_v63 = vadd.f32 %v323_v62, %v309_v59 }
 0x17e   :  { %vm325_vm0 = vcmp.ge.f32.partialorder %v324_v63, 1.0 }
 0x17f   :  { %v353_v0 = vsel %vm325_vm0, 1.0, %v364_v36 }
 0x180   :  { %v328_v1 = vadd.f32 %v353_v0, %v351_v56 }
 0x182   :  { %330 = vst.msk [vmem:[%s513_s5] sm:$0x3] %vm329_vm1, %v328_v1 }

</bundles_post_ra>
